<compile_context>
chip_gen: v5e
topology: v5e:2x2
jax: 0.10.0
libtpu: 0.0.40
codegen_flags: <defaults>
</compile_context>

<pallas_src>
import jax
import jax.numpy as jnp
from jax import lax
from jax.experimental import pallas as pl
from jax.experimental.pallas import tpu as pltpu


def _vmem_limit_bytes():
    """Generation-aware VMEM budget with headroom for compiler-internal scratch."""
    cap = None
    try:
        cap = getattr(pltpu.get_tpu_info(), "vmem_capacity_bytes", None)
    except Exception:
        cap = None
    if not cap:
        cap = 64 * 1024 * 1024  # conservative default (v7x-sized)
    return min(int(cap * 0.8), 110 * 1024 * 1024)


def _make_kernel(num_mid):
    """Fused forward kernel: one block of TB examples ((TB, N, F) rows) per grid step."""
    use_fori = num_mid >= 4  # keep the Python unroll only for shallow nets

    def equiv(h, wl, wg, b):
        # h: (TB, N, Hin) f32 (or bf16 for the input layer); wl/wg: bf16; b: (1, Hout) f32.
        tb_, n_, hin = h.shape
        hout = wl.shape[-1]
        hb = h.astype(jnp.bfloat16)
        m = jnp.mean(h.astype(jnp.float32), axis=1)                     # (TB, Hin) f32 (XLU)
        lam = jnp.dot(hb.reshape(tb_ * n_, hin), wl,
                      preferred_element_type=jnp.float32)               # (TB*N, Hout) MXU
        gam = jnp.dot(m.astype(jnp.bfloat16), wg,
                      preferred_element_type=jnp.float32)               # (TB, Hout) MXU
        # bias + relu in f32 on the VPU; gamma term broadcast back over the N (sublane) axis.
        return jnp.maximum(lam.reshape(tb_, n_, hout) + gam[:, None, :] + b, 0.0)

    def kernel(x_ref, w0l_ref, w0g_ref, b0_ref,
               wml_ref, wmg_ref, bm_ref, wi_ref, bi_ref, o_ref):
        # ---- first equivariant layer: Fin -> H ----
        h = equiv(x_ref[...], w0l_ref[...], w0g_ref[...], b0_ref[...])   # (TB, N, H) f32

        # ---- middle equivariant layers: H -> H ----
        if num_mid > 0:
            if use_fori:
                def body(l, hc):
                    return equiv(hc, wml_ref[l], wmg_ref[l], bm_ref[pl.ds(l, 1), :])
                h = lax.fori_loop(0, num_mid, body, h)
            else:
                for l in range(num_mid):
                    h = equiv(h, wml_ref[l], wmg_ref[l], bm_ref[pl.ds(l, 1), :])

        # ---- invariant head: mean over points commuted with the linear (exact) ----
        mh = jnp.mean(h, axis=1)                                          # (TB, H) f32
        out = jnp.dot(mh.astype(jnp.bfloat16), wi_ref[...],
                      preferred_element_type=jnp.float32) + bi_ref[...]   # (TB, C_pad) f32
        o_ref[0] = out

    return kernel


def symmetric_model_forward(x, params, *, tb=None):
    """x: (B, N, Fin) float32. Returns (B, C) float32."""
    w0l, w0g, b0, wml, wmg, bm, wi, bi = params
    B, N, Fin = x.shape
    H = w0l.shape[1]
    C = wi.shape[1]
    num_mid = wml.shape[0]

    # ---- batch-block size: ~512 rows/step for v5e/v6e, >=2 grid steps for v7x megacore,
    #      and a divisor of B so no padding / whole-batch copy is ever needed. ----
    if tb is None:
        target_rows = 512
        tb = max(1, min(B, target_rows // max(N, 1)))
        if B >= 2:
            tb = min(tb, -(-B // 2))          # keep at least 2 grid steps
    tb = max(1, min(int(tb), B))
    while B % tb != 0:                        # largest divisor of B <= requested tb
        tb -= 1
    G = B // tb

    # ---- dtypes & head padding (lane-dense (TB, C_pad) output tile) ----
    C_pad = max(128, -(-C // 128) * 128)
    xb = x.astype(jnp.bfloat16)
    w0l_b = w0l.astype(jnp.bfloat16)
    w0g_b = w0g.astype(jnp.bfloat16)
    b0_f = b0.astype(jnp.float32).reshape(1, H)
    if num_mid > 0:
        wml_b = wml.astype(jnp.bfloat16)
        wmg_b = wmg.astype(jnp.bfloat16)
        bm_f = bm.astype(jnp.float32)
    else:  # dummies (unused) so the argument list stays fixed
        wml_b = jnp.zeros((1, H, H), jnp.bfloat16)
        wmg_b = jnp.zeros((1, H, H), jnp.bfloat16)
        bm_f = jnp.zeros((1, H), jnp.float32)
    wi_b = jnp.zeros((H, C_pad), jnp.bfloat16).at[:, :C].set(wi.astype(jnp.bfloat16))
    bi_f = jnp.zeros((1, C_pad), jnp.float32).at[:, :C].set(bi.astype(jnp.float32).reshape(1, C))

    kernel = _make_kernel(num_mid)

    def build(single_buffer_consts):
        def const_spec(shape):
            nd = len(shape)

            def idx(b):
                return (0,) * nd

            if single_buffer_consts:
                # These blocks never change across the grid: single-buffer them.
                return pl.BlockSpec(tuple(shape), idx, pipeline_mode=pl.Buffered(1))
            return pl.BlockSpec(tuple(shape), idx)

        in_specs = [
            pl.BlockSpec((tb, N, Fin), lambda b: (b, 0, 0)),   # TB examples per grid step
            const_spec(w0l_b.shape),
            const_spec(w0g_b.shape),
            const_spec(b0_f.shape),
            const_spec(wml_b.shape),
            const_spec(wmg_b.shape),
            const_spec(bm_f.shape),
            const_spec(wi_b.shape),
            const_spec(bi_f.shape),
        ]
        return pl.pallas_call(
            kernel,
            out_shape=jax.ShapeDtypeStruct((G, tb, C_pad), jnp.float32),
            grid_spec=pltpu.PrefetchScalarGridSpec(
                num_scalar_prefetch=0,
                grid=(G,),
                in_specs=in_specs,
                out_specs=pl.BlockSpec((1, tb, C_pad), lambda b: (b, 0, 0)),
            ),
            compiler_params=pltpu.CompilerParams(
                dimension_semantics=("parallel",),   # batch axis: split across TCs on v7x
                vmem_limit_bytes=_vmem_limit_bytes(),
            ),
        )

    args = (xb, w0l_b, w0g_b, b0_f, wml_b, wmg_b, bm_f, wi_b, bi_f)
    try:
        out = build(True)(*args)
    except Exception:
        # Fallback if this jax version rejects pipeline_mode=pl.Buffered(1):
        # identical kernel with default double-buffered constant blocks.
        out = build(False)(*args)

    return out.reshape(B, C_pad)[:, :C]


def make_params(key, feature_in, num_classes, num_layers, hidden_dim):
    ks = jax.random.split(key, 8)
    num_mid = num_layers - 2
    s0 = 1.0 / jnp.sqrt(feature_in)
    sh = 1.0 / jnp.sqrt(hidden_dim)
    w0l = jax.random.uniform(ks[0], (feature_in, hidden_dim), jnp.float32, -s0, s0)
    w0g = jax.random.uniform(ks[1], (feature_in, hidden_dim), jnp.float32, -s0, s0)
    b0 = jax.random.uniform(ks[2], (1, hidden_dim), jnp.float32, -s0, s0)
    wml = jax.random.uniform(ks[3], (num_mid, hidden_dim, hidden_dim), jnp.float32, -sh, sh)
    wmg = jax.random.uniform(ks[4], (num_mid, hidden_dim, hidden_dim), jnp.float32, -sh, sh)
    bm = jax.random.uniform(ks[5], (num_mid, hidden_dim), jnp.float32, -sh, sh)
    wi = jax.random.uniform(ks[6], (hidden_dim, num_classes), jnp.float32, -sh, sh)
    bi = jax.random.uniform(ks[7], (1, num_classes), jnp.float32, -sh, sh)
    return (w0l, w0g, b0, wml, wmg, bm, wi, bi)


def reference_forward(x, params):
    """Pure-JAX reference with the original module's op order (for correctness check)."""
    w0l, w0g, b0, wml, wmg, bm, wi, bi = params

    def equiv(h, wl, wg, b):
        m = jnp.mean(h, axis=1, keepdims=True)
        return jax.nn.relu(h @ wl + m @ wg + b)

    h = equiv(x, w0l, w0g, b0)
    for l in range(wml.shape[0]):
        h = equiv(h, wml[l], wmg[l], bm[l:l + 1])
    y = h @ wi + bi
    return jnp.mean(y, axis=1)


if __name__ == "__main__":
    # Small, module-consistent shapes: batch=2, num_points=16, feature_in=8,
    # hidden_dim=32, num_classes=4, num_layers=4.
    B, N, Fin, H, C, L = 2, 16, 8, 32, 4, 4

    key = jax.random.PRNGKey(0)
    kx, kp = jax.random.split(key)
    x = jax.random.normal(kx, (B, N, Fin), dtype=jnp.float32)
    params = make_params(kp, Fin, C, L, H)

    out = jax.block_until_ready(symmetric_model_forward(x, params))
    ref = jax.block_until_ready(reference_forward(x, params))

    assert out.shape == (B, C), out.shape
    # Tolerance absorbs bf16 MXU inputs (numerically equivalent to TPU DEFAULT-precision
    # f32 matmuls) and the exact-in-real-arithmetic commutation of the final mean.
    assert jnp.allclose(out, ref, rtol=2e-2, atol=2e-2), (out, ref)

    print("KERNEL_OK")
</pallas_src>

<mosaic_0001>
module attributes {stable_mosaic.version = 11 : i64} {
  func.func @kernel(%arg0: i32, %arg1: memref<1x16x8xbf16, #tpu.memory_space<vmem>>, %arg2: memref<8x32xbf16, #tpu.memory_space<vmem>>, %arg3: memref<8x32xbf16, #tpu.memory_space<vmem>>, %arg4: memref<1x32xf32, #tpu.memory_space<vmem>>, %arg5: memref<2x32x32xbf16, #tpu.memory_space<vmem>>, %arg6: memref<2x32x32xbf16, #tpu.memory_space<vmem>>, %arg7: memref<2x32xf32, #tpu.memory_space<vmem>>, %arg8: memref<32x128xbf16, #tpu.memory_space<vmem>>, %arg9: memref<1x128xf32, #tpu.memory_space<vmem>>, %arg10: memref<1x1x128xf32, #tpu.memory_space<vmem>>) attributes {dimension_semantics = [#tpu.dimension_semantics<parallel>], iteration_bounds = array<i64: 2>, scalar_prefetch = 0 : i64, scratch_operands = 0 : i64, tpu.core_type = #tpu.core_type<tc>, window_params = [{transform_indices = @transform_0, window_bounds = array<i64: 1, 16, 8>}, {pipeline_mode = #tpu.pipeline_mode<synchronous>, transform_indices = @transform_1, window_bounds = array<i64: 8, 32>}, {pipeline_mode = #tpu.pipeline_mode<synchronous>, transform_indices = @transform_2, window_bounds = array<i64: 8, 32>}, {pipeline_mode = #tpu.pipeline_mode<synchronous>, transform_indices = @transform_3, window_bounds = array<i64: 1, 32>}, {pipeline_mode = #tpu.pipeline_mode<synchronous>, transform_indices = @transform_4, window_bounds = array<i64: 2, 32, 32>}, {pipeline_mode = #tpu.pipeline_mode<synchronous>, transform_indices = @transform_5, window_bounds = array<i64: 2, 32, 32>}, {pipeline_mode = #tpu.pipeline_mode<synchronous>, transform_indices = @transform_6, window_bounds = array<i64: 2, 32>}, {pipeline_mode = #tpu.pipeline_mode<synchronous>, transform_indices = @transform_7, window_bounds = array<i64: 32, 128>}, {pipeline_mode = #tpu.pipeline_mode<synchronous>, transform_indices = @transform_8, window_bounds = array<i64: 1, 128>}, {transform_indices = @transform_9, window_bounds = array<i64: 1, 1, 128>}]} {
    %c0 = arith.constant 0 : index
    %c0_0 = arith.constant 0 : index
    %c0_1 = arith.constant 0 : index
    %0 = vector.load %arg1[%c0, %c0_0, %c0_1] : memref<1x16x8xbf16, #tpu.memory_space<vmem>>, vector<1x16x8xbf16>
    %c0_2 = arith.constant 0 : index
    %c0_3 = arith.constant 0 : index
    %1 = vector.load %arg2[%c0_2, %c0_3] : memref<8x32xbf16, #tpu.memory_space<vmem>>, vector<8x32xbf16>
    %c0_4 = arith.constant 0 : index
    %c0_5 = arith.constant 0 : index
    %2 = vector.load %arg3[%c0_4, %c0_5] : memref<8x32xbf16, #tpu.memory_space<vmem>>, vector<8x32xbf16>
    %c0_6 = arith.constant 0 : index
    %c0_7 = arith.constant 0 : index
    %3 = vector.load %arg4[%c0_6, %c0_7] : memref<1x32xf32, #tpu.memory_space<vmem>>, vector<1x32xf32>
    %4 = arith.extf %0 : vector<1x16x8xbf16> to vector<1x16x8xf32>
    %cst = arith.constant dense<0.000000e+00> : vector<1x8xf32>
    %5 = vector.multi_reduction <add>, %4, %cst [1] : vector<1x16x8xf32> to vector<1x8xf32>
    %cst_8 = arith.constant 1.600000e+01 : f32
    %6 = vector.broadcast %cst_8 : f32 to vector<1x8xf32>
    %7 = arith.divf %5, %6 : vector<1x8xf32>
    %8 = vector.shape_cast %0 : vector<1x16x8xbf16> to vector<16x8xbf16>
    %cst_9 = arith.constant dense<0.000000e+00> : vector<16x32xf32>
    %9 = tpu.matmul %8, %1, %cst_9 {dimension_numbers = #tpu.dot_dimension_numbers<[1], [0], [0], [1], [0, 0, 1, 1], [], []>} : vector<16x8xbf16>, vector<8x32xbf16>, vector<16x32xf32> -> vector<16x32xf32>
    %10 = arith.truncf %7 : vector<1x8xf32> to vector<1x8xbf16>
    %cst_10 = arith.constant dense<0.000000e+00> : vector<1x32xf32>
    %11 = tpu.matmul %10, %2, %cst_10 {dimension_numbers = #tpu.dot_dimension_numbers<[1], [0], [0], [1], [0, 0, 1, 1], [], []>} : vector<1x8xbf16>, vector<8x32xbf16>, vector<1x32xf32> -> vector<1x32xf32>
    %12 = vector.shape_cast %9 : vector<16x32xf32> to vector<1x16x32xf32>
    %13 = vector.shape_cast %11 : vector<1x32xf32> to vector<1x1x32xf32>
    %14 = vector.broadcast %13 : vector<1x1x32xf32> to vector<1x16x32xf32>
    %15 = arith.addf %12, %14 : vector<1x16x32xf32>
    %16 = vector.shape_cast %3 : vector<1x32xf32> to vector<1x1x32xf32>
    %17 = vector.broadcast %16 : vector<1x1x32xf32> to vector<1x16x32xf32>
    %18 = arith.addf %15, %17 : vector<1x16x32xf32>
    %cst_11 = arith.constant 0.000000e+00 : f32
    %19 = vector.broadcast %cst_11 : f32 to vector<1x16x32xf32>
    %20 = arith.maximumf %18, %19 : vector<1x16x32xf32>
    %c0_12 = arith.constant 0 : index
    %c0_13 = arith.constant 0 : index
    %c0_14 = arith.constant 0 : index
    %21 = vector.load %arg5[%c0_12, %c0_13, %c0_14] : memref<2x32x32xbf16, #tpu.memory_space<vmem>>, vector<1x32x32xbf16>
    %22 = vector.shape_cast %21 : vector<1x32x32xbf16> to vector<32x32xbf16>
    %c0_15 = arith.constant 0 : index
    %c0_16 = arith.constant 0 : index
    %c0_17 = arith.constant 0 : index
    %23 = vector.load %arg6[%c0_15, %c0_16, %c0_17] : memref<2x32x32xbf16, #tpu.memory_space<vmem>>, vector<1x32x32xbf16>
    %24 = vector.shape_cast %23 : vector<1x32x32xbf16> to vector<32x32xbf16>
    %c0_18 = arith.constant 0 : index
    %c0_19 = arith.constant 0 : index
    %25 = vector.load %arg7[%c0_18, %c0_19] : memref<2x32xf32, #tpu.memory_space<vmem>>, vector<1x32xf32>
    %26 = arith.truncf %20 : vector<1x16x32xf32> to vector<1x16x32xbf16>
    %cst_20 = arith.constant dense<0.000000e+00> : vector<1x32xf32>
    %27 = vector.multi_reduction <add>, %20, %cst_20 [1] : vector<1x16x32xf32> to vector<1x32xf32>
    %cst_21 = arith.constant 1.600000e+01 : f32
    %28 = vector.broadcast %cst_21 : f32 to vector<1x32xf32>
    %29 = arith.divf %27, %28 : vector<1x32xf32>
    %30 = vector.shape_cast %26 : vector<1x16x32xbf16> to vector<16x32xbf16>
    %cst_22 = arith.constant dense<0.000000e+00> : vector<16x32xf32>
    %31 = tpu.matmul %30, %22, %cst_22 {dimension_numbers = #tpu.dot_dimension_numbers<[1], [0], [0], [1], [0, 0, 1, 1], [], []>} : vector<16x32xbf16>, vector<32x32xbf16>, vector<16x32xf32> -> vector<16x32xf32>
    %32 = arith.truncf %29 : vector<1x32xf32> to vector<1x32xbf16>
    %cst_23 = arith.constant dense<0.000000e+00> : vector<1x32xf32>
    %33 = tpu.matmul %32, %24, %cst_23 {dimension_numbers = #tpu.dot_dimension_numbers<[1], [0], [0], [1], [0, 0, 1, 1], [], []>} : vector<1x32xbf16>, vector<32x32xbf16>, vector<1x32xf32> -> vector<1x32xf32>
    %34 = vector.shape_cast %31 : vector<16x32xf32> to vector<1x16x32xf32>
    %35 = vector.shape_cast %33 : vector<1x32xf32> to vector<1x1x32xf32>
    %36 = vector.broadcast %35 : vector<1x1x32xf32> to vector<1x16x32xf32>
    %37 = arith.addf %34, %36 : vector<1x16x32xf32>
    %38 = vector.shape_cast %25 : vector<1x32xf32> to vector<1x1x32xf32>
    %39 = vector.broadcast %38 : vector<1x1x32xf32> to vector<1x16x32xf32>
    %40 = arith.addf %37, %39 : vector<1x16x32xf32>
    %cst_24 = arith.constant 0.000000e+00 : f32
    %41 = vector.broadcast %cst_24 : f32 to vector<1x16x32xf32>
    %42 = arith.maximumf %40, %41 : vector<1x16x32xf32>
    %c1 = arith.constant 1 : index
    %c0_25 = arith.constant 0 : index
    %c0_26 = arith.constant 0 : index
    %43 = vector.load %arg5[%c1, %c0_25, %c0_26] : memref<2x32x32xbf16, #tpu.memory_space<vmem>>, vector<1x32x32xbf16>
    %44 = vector.shape_cast %43 : vector<1x32x32xbf16> to vector<32x32xbf16>
    %c1_27 = arith.constant 1 : index
    %c0_28 = arith.constant 0 : index
    %c0_29 = arith.constant 0 : index
    %45 = vector.load %arg6[%c1_27, %c0_28, %c0_29] : memref<2x32x32xbf16, #tpu.memory_space<vmem>>, vector<1x32x32xbf16>
    %46 = vector.shape_cast %45 : vector<1x32x32xbf16> to vector<32x32xbf16>
    %c1_30 = arith.constant 1 : index
    %c0_31 = arith.constant 0 : index
    %47 = vector.load %arg7[%c1_30, %c0_31] : memref<2x32xf32, #tpu.memory_space<vmem>>, vector<1x32xf32>
    %48 = arith.truncf %42 : vector<1x16x32xf32> to vector<1x16x32xbf16>
    %cst_32 = arith.constant dense<0.000000e+00> : vector<1x32xf32>
    %49 = vector.multi_reduction <add>, %42, %cst_32 [1] : vector<1x16x32xf32> to vector<1x32xf32>
    %cst_33 = arith.constant 1.600000e+01 : f32
    %50 = vector.broadcast %cst_33 : f32 to vector<1x32xf32>
    %51 = arith.divf %49, %50 : vector<1x32xf32>
    %52 = vector.shape_cast %48 : vector<1x16x32xbf16> to vector<16x32xbf16>
    %cst_34 = arith.constant dense<0.000000e+00> : vector<16x32xf32>
    %53 = tpu.matmul %52, %44, %cst_34 {dimension_numbers = #tpu.dot_dimension_numbers<[1], [0], [0], [1], [0, 0, 1, 1], [], []>} : vector<16x32xbf16>, vector<32x32xbf16>, vector<16x32xf32> -> vector<16x32xf32>
    %54 = arith.truncf %51 : vector<1x32xf32> to vector<1x32xbf16>
    %cst_35 = arith.constant dense<0.000000e+00> : vector<1x32xf32>
    %55 = tpu.matmul %54, %46, %cst_35 {dimension_numbers = #tpu.dot_dimension_numbers<[1], [0], [0], [1], [0, 0, 1, 1], [], []>} : vector<1x32xbf16>, vector<32x32xbf16>, vector<1x32xf32> -> vector<1x32xf32>
    %56 = vector.shape_cast %53 : vector<16x32xf32> to vector<1x16x32xf32>
    %57 = vector.shape_cast %55 : vector<1x32xf32> to vector<1x1x32xf32>
    %58 = vector.broadcast %57 : vector<1x1x32xf32> to vector<1x16x32xf32>
    %59 = arith.addf %56, %58 : vector<1x16x32xf32>
    %60 = vector.shape_cast %47 : vector<1x32xf32> to vector<1x1x32xf32>
    %61 = vector.broadcast %60 : vector<1x1x32xf32> to vector<1x16x32xf32>
    %62 = arith.addf %59, %61 : vector<1x16x32xf32>
    %cst_36 = arith.constant 0.000000e+00 : f32
    %63 = vector.broadcast %cst_36 : f32 to vector<1x16x32xf32>
    %64 = arith.maximumf %62, %63 : vector<1x16x32xf32>
    %cst_37 = arith.constant dense<0.000000e+00> : vector<1x32xf32>
    %65 = vector.multi_reduction <add>, %64, %cst_37 [1] : vector<1x16x32xf32> to vector<1x32xf32>
    %cst_38 = arith.constant 1.600000e+01 : f32
    %66 = vector.broadcast %cst_38 : f32 to vector<1x32xf32>
    %67 = arith.divf %65, %66 : vector<1x32xf32>
    %68 = arith.truncf %67 : vector<1x32xf32> to vector<1x32xbf16>
    %c0_39 = arith.constant 0 : index
    %c0_40 = arith.constant 0 : index
    %69 = vector.load %arg8[%c0_39, %c0_40] : memref<32x128xbf16, #tpu.memory_space<vmem>>, vector<32x128xbf16>
    %cst_41 = arith.constant dense<0.000000e+00> : vector<1x128xf32>
    %70 = tpu.matmul %68, %69, %cst_41 {dimension_numbers = #tpu.dot_dimension_numbers<[1], [0], [0], [1], [0, 0, 1, 1], [], []>} : vector<1x32xbf16>, vector<32x128xbf16>, vector<1x128xf32> -> vector<1x128xf32>
    %c0_42 = arith.constant 0 : index
    %c0_43 = arith.constant 0 : index
    %71 = vector.load %arg9[%c0_42, %c0_43] : memref<1x128xf32, #tpu.memory_space<vmem>>, vector<1x128xf32>
    %72 = arith.addf %70, %71 : vector<1x128xf32>
    %c0_44 = arith.constant 0 : index
    %c0_45 = arith.constant 0 : index
    %c0_46 = arith.constant 0 : index
    %73 = vector.load %arg10[%c0_44, %c0_45, %c0_46] : memref<1x1x128xf32, #tpu.memory_space<vmem>>, vector<1x1x128xf32>
    %74 = vector.shape_cast %73 : vector<1x1x128xf32> to vector<1x128xf32>
    %75 = vector.shape_cast %72 : vector<1x128xf32> to vector<1x1x128xf32>
    tpu.vector_store %arg10[%c0_44, %c0_45, %c0_46], %75 {strides = array<i32>} : memref<1x1x128xf32, #tpu.memory_space<vmem>>, vector<1x1x128xf32>,
    return
  }
  func.func @transform_0(%arg0: i32) -> (i32, i32, i32) {
    %c0_i32 = arith.constant 0 : i32
    %c0_i32_0 = arith.constant 0 : i32
    %c0_i32_1 = arith.constant 0 : i32
    return %arg0, %c0_i32, %c0_i32_0 : i32, i32, i32
  }
  func.func @transform_1(%arg0: i32) -> (i32, i32) {
    %c0_i32 = arith.constant 0 : i32
    %c0_i32_0 = arith.constant 0 : i32
    %c0_i32_1 = arith.constant 0 : i32
    return %c0_i32, %c0_i32_0 : i32, i32
  }
  func.func @transform_2(%arg0: i32) -> (i32, i32) {
    %c0_i32 = arith.constant 0 : i32
    %c0_i32_0 = arith.constant 0 : i32
    %c0_i32_1 = arith.constant 0 : i32
    return %c0_i32, %c0_i32_0 : i32, i32
  }
  func.func @transform_3(%arg0: i32) -> (i32, i32) {
    %c0_i32 = arith.constant 0 : i32
    %c0_i32_0 = arith.constant 0 : i32
    %c0_i32_1 = arith.constant 0 : i32
    return %c0_i32, %c0_i32_0 : i32, i32
  }
  func.func @transform_4(%arg0: i32) -> (i32, i32, i32) {
    %c0_i32 = arith.constant 0 : i32
    %c0_i32_0 = arith.constant 0 : i32
    %c0_i32_1 = arith.constant 0 : i32
    %c0_i32_2 = arith.constant 0 : i32
    return %c0_i32, %c0_i32_0, %c0_i32_1 : i32, i32, i32
  }
  func.func @transform_5(%arg0: i32) -> (i32, i32, i32) {
    %c0_i32 = arith.constant 0 : i32
    %c0_i32_0 = arith.constant 0 : i32
    %c0_i32_1 = arith.constant 0 : i32
    %c0_i32_2 = arith.constant 0 : i32
    return %c0_i32, %c0_i32_0, %c0_i32_1 : i32, i32, i32
  }
  func.func @transform_6(%arg0: i32) -> (i32, i32) {
    %c0_i32 = arith.constant 0 : i32
    %c0_i32_0 = arith.constant 0 : i32
    %c0_i32_1 = arith.constant 0 : i32
    return %c0_i32, %c0_i32_0 : i32, i32
  }
  func.func @transform_7(%arg0: i32) -> (i32, i32) {
    %c0_i32 = arith.constant 0 : i32
    %c0_i32_0 = arith.constant 0 : i32
    %c0_i32_1 = arith.constant 0 : i32
    return %c0_i32, %c0_i32_0 : i32, i32
  }
  func.func @transform_8(%arg0: i32) -> (i32, i32) {
    %c0_i32 = arith.constant 0 : i32
    %c0_i32_0 = arith.constant 0 : i32
    %c0_i32_1 = arith.constant 0 : i32
    return %c0_i32, %c0_i32_0 : i32, i32
  }
  func.func @transform_9(%arg0: i32) -> (i32, i32, i32) {
    %c0_i32 = arith.constant 0 : i32
    %c0_i32_0 = arith.constant 0 : i32
    %c0_i32_1 = arith.constant 0 : i32
    return %arg0, %c0_i32, %c0_i32_0 : i32, i32, i32
  }
}

module attributes {stable_mosaic.version = 11 : i64} {
  func.func @kernel(%arg0: i32, %arg1: memref<1x16x8xbf16, #tpu.memory_space<vmem>>, %arg2: memref<8x32xbf16, #tpu.memory_space<vmem>>, %arg3: memref<8x32xbf16, #tpu.memory_space<vmem>>, %arg4: memref<1x32xf32, #tpu.memory_space<vmem>>, %arg5: memref<2x32x32xbf16, #tpu.memory_space<vmem>>, %arg6: memref<2x32x32xbf16, #tpu.memory_space<vmem>>, %arg7: memref<2x32xf32, #tpu.memory_space<vmem>>, %arg8: memref<32x128xbf16, #tpu.memory_space<vmem>>, %arg9: memref<1x128xf32, #tpu.memory_space<vmem>>, %arg10: memref<1x1x128xf32, #tpu.memory_space<vmem>>) attributes {dimension_semantics = [#tpu.dimension_semantics<parallel>], iteration_bounds = array<i64: 2>, scalar_prefetch = 0 : i64, scratch_operands = 0 : i64, tpu.core_type = #tpu.core_type<tc>, window_params = [{transform_indices = @transform_0, window_bounds = array<i64: 1, 16, 8>}, {pipeline_mode = #tpu.pipeline_mode<synchronous>, transform_indices = @transform_1, window_bounds = array<i64: 8, 32>}, {pipeline_mode = #tpu.pipeline_mode<synchronous>, transform_indices = @transform_2, window_bounds = array<i64: 8, 32>}, {pipeline_mode = #tpu.pipeline_mode<synchronous>, transform_indices = @transform_3, window_bounds = array<i64: 1, 32>}, {pipeline_mode = #tpu.pipeline_mode<synchronous>, transform_indices = @transform_4, window_bounds = array<i64: 2, 32, 32>}, {pipeline_mode = #tpu.pipeline_mode<synchronous>, transform_indices = @transform_5, window_bounds = array<i64: 2, 32, 32>}, {pipeline_mode = #tpu.pipeline_mode<synchronous>, transform_indices = @transform_6, window_bounds = array<i64: 2, 32>}, {pipeline_mode = #tpu.pipeline_mode<synchronous>, transform_indices = @transform_7, window_bounds = array<i64: 32, 128>}, {pipeline_mode = #tpu.pipeline_mode<synchronous>, transform_indices = @transform_8, window_bounds = array<i64: 1, 128>}, {transform_indices = @transform_9, window_bounds = array<i64: 1, 1, 128>}]} {
    %c0 = arith.constant 0 : index
    %c0_0 = arith.constant 0 : index
    %c0_1 = arith.constant 0 : index
    %0 = vector.load %arg1[%c0, %c0_0, %c0_1] : memref<1x16x8xbf16, #tpu.memory_space<vmem>>, vector<1x16x8xbf16>
    %c0_2 = arith.constant 0 : index
    %c0_3 = arith.constant 0 : index
    %1 = vector.load %arg2[%c0_2, %c0_3] : memref<8x32xbf16, #tpu.memory_space<vmem>>, vector<8x32xbf16>
    %c0_4 = arith.constant 0 : index
    %c0_5 = arith.constant 0 : index
    %2 = vector.load %arg3[%c0_4, %c0_5] : memref<8x32xbf16, #tpu.memory_space<vmem>>, vector<8x32xbf16>
    %c0_6 = arith.constant 0 : index
    %c0_7 = arith.constant 0 : index
    %3 = vector.load %arg4[%c0_6, %c0_7] : memref<1x32xf32, #tpu.memory_space<vmem>>, vector<1x32xf32>
    %4 = arith.extf %0 : vector<1x16x8xbf16> to vector<1x16x8xf32>
    %cst = arith.constant dense<0.000000e+00> : vector<1x8xf32>
    %5 = vector.multi_reduction <add>, %4, %cst [1] : vector<1x16x8xf32> to vector<1x8xf32>
    %cst_8 = arith.constant 1.600000e+01 : f32
    %6 = vector.broadcast %cst_8 : f32 to vector<1x8xf32>
    %7 = arith.divf %5, %6 : vector<1x8xf32>
    %8 = vector.shape_cast %0 : vector<1x16x8xbf16> to vector<16x8xbf16>
    %cst_9 = arith.constant dense<0.000000e+00> : vector<16x32xf32>
    %9 = tpu.matmul %8, %1, %cst_9 {dimension_numbers = #tpu.dot_dimension_numbers<[1], [0], [0], [1], [0, 0, 1, 1], [], []>} : vector<16x8xbf16>, vector<8x32xbf16>, vector<16x32xf32> -> vector<16x32xf32>
    %10 = arith.truncf %7 : vector<1x8xf32> to vector<1x8xbf16>
    %cst_10 = arith.constant dense<0.000000e+00> : vector<1x32xf32>
    %11 = tpu.matmul %10, %2, %cst_10 {dimension_numbers = #tpu.dot_dimension_numbers<[1], [0], [0], [1], [0, 0, 1, 1], [], []>} : vector<1x8xbf16>, vector<8x32xbf16>, vector<1x32xf32> -> vector<1x32xf32>
    %12 = vector.shape_cast %9 : vector<16x32xf32> to vector<1x16x32xf32>
    %13 = vector.shape_cast %11 : vector<1x32xf32> to vector<1x1x32xf32>
    %14 = vector.broadcast %13 : vector<1x1x32xf32> to vector<1x16x32xf32>
    %15 = arith.addf %12, %14 : vector<1x16x32xf32>
    %16 = vector.shape_cast %3 : vector<1x32xf32> to vector<1x1x32xf32>
    %17 = vector.broadcast %16 : vector<1x1x32xf32> to vector<1x16x32xf32>
    %18 = arith.addf %15, %17 : vector<1x16x32xf32>
    %cst_11 = arith.constant 0.000000e+00 : f32
    %19 = vector.broadcast %cst_11 : f32 to vector<1x16x32xf32>
    %20 = arith.maximumf %18, %19 : vector<1x16x32xf32>
    %c0_12 = arith.constant 0 : index
    %c0_13 = arith.constant 0 : index
    %c0_14 = arith.constant 0 : index
    %21 = vector.load %arg5[%c0_12, %c0_13, %c0_14] : memref<2x32x32xbf16, #tpu.memory_space<vmem>>, vector<1x32x32xbf16>
    %22 = vector.shape_cast %21 : vector<1x32x32xbf16> to vector<32x32xbf16>
    %c0_15 = arith.constant 0 : index
    %c0_16 = arith.constant 0 : index
    %c0_17 = arith.constant 0 : index
    %23 = vector.load %arg6[%c0_15, %c0_16, %c0_17] : memref<2x32x32xbf16, #tpu.memory_space<vmem>>, vector<1x32x32xbf16>
    %24 = vector.shape_cast %23 : vector<1x32x32xbf16> to vector<32x32xbf16>
    %c0_18 = arith.constant 0 : index
    %c0_19 = arith.constant 0 : index
    %25 = vector.load %arg7[%c0_18, %c0_19] : memref<2x32xf32, #tpu.memory_space<vmem>>, vector<1x32xf32>
    %26 = arith.truncf %20 : vector<1x16x32xf32> to vector<1x16x32xbf16>
    %cst_20 = arith.constant dense<0.000000e+00> : vector<1x32xf32>
    %27 = vector.multi_reduction <add>, %20, %cst_20 [1] : vector<1x16x32xf32> to vector<1x32xf32>
    %cst_21 = arith.constant 1.600000e+01 : f32
    %28 = vector.broadcast %cst_21 : f32 to vector<1x32xf32>
    %29 = arith.divf %27, %28 : vector<1x32xf32>
    %30 = vector.shape_cast %26 : vector<1x16x32xbf16> to vector<16x32xbf16>
    %cst_22 = arith.constant dense<0.000000e+00> : vector<16x32xf32>
    %31 = tpu.matmul %30, %22, %cst_22 {dimension_numbers = #tpu.dot_dimension_numbers<[1], [0], [0], [1], [0, 0, 1, 1], [], []>} : vector<16x32xbf16>, vector<32x32xbf16>, vector<16x32xf32> -> vector<16x32xf32>
    %32 = arith.truncf %29 : vector<1x32xf32> to vector<1x32xbf16>
    %cst_23 = arith.constant dense<0.000000e+00> : vector<1x32xf32>
    %33 = tpu.matmul %32, %24, %cst_23 {dimension_numbers = #tpu.dot_dimension_numbers<[1], [0], [0], [1], [0, 0, 1, 1], [], []>} : vector<1x32xbf16>, vector<32x32xbf16>, vector<1x32xf32> -> vector<1x32xf32>
    %34 = vector.shape_cast %31 : vector<16x32xf32> to vector<1x16x32xf32>
    %35 = vector.shape_cast %33 : vector<1x32xf32> to vector<1x1x32xf32>
    %36 = vector.broadcast %35 : vector<1x1x32xf32> to vector<1x16x32xf32>
    %37 = arith.addf %34, %36 : vector<1x16x32xf32>
    %38 = vector.shape_cast %25 : vector<1x32xf32> to vector<1x1x32xf32>
    %39 = vector.broadcast %38 : vector<1x1x32xf32> to vector<1x16x32xf32>
    %40 = arith.addf %37, %39 : vector<1x16x32xf32>
    %cst_24 = arith.constant 0.000000e+00 : f32
    %41 = vector.broadcast %cst_24 : f32 to vector<1x16x32xf32>
    %42 = arith.maximumf %40, %41 : vector<1x16x32xf32>
    %c1 = arith.constant 1 : index
    %c0_25 = arith.constant 0 : index
    %c0_26 = arith.constant 0 : index
    %43 = vector.load %arg5[%c1, %c0_25, %c0_26] : memref<2x32x32xbf16, #tpu.memory_space<vmem>>, vector<1x32x32xbf16>
    %44 = vector.shape_cast %43 : vector<1x32x32xbf16> to vector<32x32xbf16>
    %c1_27 = arith.constant 1 : index
    %c0_28 = arith.constant 0 : index
    %c0_29 = arith.constant 0 : index
    %45 = vector.load %arg6[%c1_27, %c0_28, %c0_29] : memref<2x32x32xbf16, #tpu.memory_space<vmem>>, vector<1x32x32xbf16>
    %46 = vector.shape_cast %45 : vector<1x32x32xbf16> to vector<32x32xbf16>
    %c1_30 = arith.constant 1 : index
    %c0_31 = arith.constant 0 : index
    %47 = vector.load %arg7[%c1_30, %c0_31] : memref<2x32xf32, #tpu.memory_space<vmem>>, vector<1x32xf32>
    %48 = arith.truncf %42 : vector<1x16x32xf32> to vector<1x16x32xbf16>
    %cst_32 = arith.constant dense<0.000000e+00> : vector<1x32xf32>
    %49 = vector.multi_reduction <add>, %42, %cst_32 [1] : vector<1x16x32xf32> to vector<1x32xf32>
    %cst_33 = arith.constant 1.600000e+01 : f32
    %50 = vector.broadcast %cst_33 : f32 to vector<1x32xf32>
    %51 = arith.divf %49, %50 : vector<1x32xf32>
    %52 = vector.shape_cast %48 : vector<1x16x32xbf16> to vector<16x32xbf16>
    %cst_34 = arith.constant dense<0.000000e+00> : vector<16x32xf32>
    %53 = tpu.matmul %52, %44, %cst_34 {dimension_numbers = #tpu.dot_dimension_numbers<[1], [0], [0], [1], [0, 0, 1, 1], [], []>} : vector<16x32xbf16>, vector<32x32xbf16>, vector<16x32xf32> -> vector<16x32xf32>
    %54 = arith.truncf %51 : vector<1x32xf32> to vector<1x32xbf16>
    %cst_35 = arith.constant dense<0.000000e+00> : vector<1x32xf32>
    %55 = tpu.matmul %54, %46, %cst_35 {dimension_numbers = #tpu.dot_dimension_numbers<[1], [0], [0], [1], [0, 0, 1, 1], [], []>} : vector<1x32xbf16>, vector<32x32xbf16>, vector<1x32xf32> -> vector<1x32xf32>
    %56 = vector.shape_cast %53 : vector<16x32xf32> to vector<1x16x32xf32>
    %57 = vector.shape_cast %55 : vector<1x32xf32> to vector<1x1x32xf32>
    %58 = vector.broadcast %57 : vector<1x1x32xf32> to vector<1x16x32xf32>
    %59 = arith.addf %56, %58 : vector<1x16x32xf32>
    %60 = vector.shape_cast %47 : vector<1x32xf32> to vector<1x1x32xf32>
    %61 = vector.broadcast %60 : vector<1x1x32xf32> to vector<1x16x32xf32>
    %62 = arith.addf %59, %61 : vector<1x16x32xf32>
    %cst_36 = arith.constant 0.000000e+00 : f32
    %63 = vector.broadcast %cst_36 : f32 to vector<1x16x32xf32>
    %64 = arith.maximumf %62, %63 : vector<1x16x32xf32>
    %cst_37 = arith.constant dense<0.000000e+00> : vector<1x32xf32>
    %65 = vector.multi_reduction <add>, %64, %cst_37 [1] : vector<1x16x32xf32> to vector<1x32xf32>
    %cst_38 = arith.constant 1.600000e+01 : f32
    %66 = vector.broadcast %cst_38 : f32 to vector<1x32xf32>
    %67 = arith.divf %65, %66 : vector<1x32xf32>
    %68 = arith.truncf %67 : vector<1x32xf32> to vector<1x32xbf16>
    %c0_39 = arith.constant 0 : index
    %c0_40 = arith.constant 0 : index
    %69 = vector.load %arg8[%c0_39, %c0_40] : memref<32x128xbf16, #tpu.memory_space<vmem>>, vector<32x128xbf16>
    %cst_41 = arith.constant dense<0.000000e+00> : vector<1x128xf32>
    %70 = tpu.matmul %68, %69, %cst_41 {dimension_numbers = #tpu.dot_dimension_numbers<[1], [0], [0], [1], [0, 0, 1, 1], [], []>} : vector<1x32xbf16>, vector<32x128xbf16>, vector<1x128xf32> -> vector<1x128xf32>
    %c0_42 = arith.constant 0 : index
    %c0_43 = arith.constant 0 : index
    %71 = vector.load %arg9[%c0_42, %c0_43] : memref<1x128xf32, #tpu.memory_space<vmem>>, vector<1x128xf32>
    %72 = arith.addf %70, %71 : vector<1x128xf32>
    %c0_44 = arith.constant 0 : index
    %c0_45 = arith.constant 0 : index
    %c0_46 = arith.constant 0 : index
    %73 = vector.load %arg10[%c0_44, %c0_45, %c0_46] : memref<1x1x128xf32, #tpu.memory_space<vmem>>, vector<1x1x128xf32>
    %74 = vector.shape_cast %73 : vector<1x1x128xf32> to vector<1x128xf32>
    %75 = vector.shape_cast %72 : vector<1x128xf32> to vector<1x1x128xf32>
    tpu.vector_store %arg10[%c0_44, %c0_45, %c0_46], %75 {strides = array<i32>} : memref<1x1x128xf32, #tpu.memory_space<vmem>>, vector<1x1x128xf32>,
    return
  }
  func.func @transform_0(%arg0: i32) -> (i32, i32, i32) {
    %c0_i32 = arith.constant 0 : i32
    %c0_i32_0 = arith.constant 0 : i32
    %c0_i32_1 = arith.constant 0 : i32
    return %arg0, %c0_i32, %c0_i32_0 : i32, i32, i32
  }
  func.func @transform_1(%arg0: i32) -> (i32, i32) {
    %c0_i32 = arith.constant 0 : i32
    %c0_i32_0 = arith.constant 0 : i32
    %c0_i32_1 = arith.constant 0 : i32
    return %c0_i32, %c0_i32_0 : i32, i32
  }
  func.func @transform_2(%arg0: i32) -> (i32, i32) {
    %c0_i32 = arith.constant 0 : i32
    %c0_i32_0 = arith.constant 0 : i32
    %c0_i32_1 = arith.constant 0 : i32
    return %c0_i32, %c0_i32_0 : i32, i32
  }
  func.func @transform_3(%arg0: i32) -> (i32, i32) {
    %c0_i32 = arith.constant 0 : i32
    %c0_i32_0 = arith.constant 0 : i32
    %c0_i32_1 = arith.constant 0 : i32
    return %c0_i32, %c0_i32_0 : i32, i32
  }
  func.func @transform_4(%arg0: i32) -> (i32, i32, i32) {
    %c0_i32 = arith.constant 0 : i32
    %c0_i32_0 = arith.constant 0 : i32
    %c0_i32_1 = arith.constant 0 : i32
    %c0_i32_2 = arith.constant 0 : i32
    return %c0_i32, %c0_i32_0, %c0_i32_1 : i32, i32, i32
  }
  func.func @transform_5(%arg0: i32) -> (i32, i32, i32) {
    %c0_i32 = arith.constant 0 : i32
    %c0_i32_0 = arith.constant 0 : i32
    %c0_i32_1 = arith.constant 0 : i32
    %c0_i32_2 = arith.constant 0 : i32
    return %c0_i32, %c0_i32_0, %c0_i32_1 : i32, i32, i32
  }
  func.func @transform_6(%arg0: i32) -> (i32, i32) {
    %c0_i32 = arith.constant 0 : i32
    %c0_i32_0 = arith.constant 0 : i32
    %c0_i32_1 = arith.constant 0 : i32
    return %c0_i32, %c0_i32_0 : i32, i32
  }
  func.func @transform_7(%arg0: i32) -> (i32, i32) {
    %c0_i32 = arith.constant 0 : i32
    %c0_i32_0 = arith.constant 0 : i32
    %c0_i32_1 = arith.constant 0 : i32
    return %c0_i32, %c0_i32_0 : i32, i32
  }
  func.func @transform_8(%arg0: i32) -> (i32, i32) {
    %c0_i32 = arith.constant 0 : i32
    %c0_i32_0 = arith.constant 0 : i32
    %c0_i32_1 = arith.constant 0 : i32
    return %c0_i32, %c0_i32_0 : i32, i32
  }
  func.func @transform_9(%arg0: i32) -> (i32, i32, i32) {
    %c0_i32 = arith.constant 0 : i32
    %c0_i32_0 = arith.constant 0 : i32
    %c0_i32_1 = arith.constant 0 : i32
    return %arg0, %c0_i32, %c0_i32_0 : i32, i32, i32
  }
}

</mosaic_0001>

<bundles_post_ra>
// kernel: tpu_custom_call.1
= control target key start
LH: loop header
LB: loop body
LE: loop exit
PB: predicated region body
PF: predicated region fallthrough
CT: control target
= control target key end

     0   :  { %14 = vsyncpa [#allocation3], 0  ;;  %s1253_s0 = inlined_call_operand.vmem [shape: bf16[2,16,8], index: 0, kind: input, shape index: {}]   ;;  %s1254_s1 = inlined_call_operand.vmem [shape: bf16[8,32], index: 1, kind: input, shape index: {}]   ;;  %s1255_s2 = inlined_call_operand.vmem [shape: bf16[8,32], index: 2, kind: input, shape index: {}]   ;;  %s1256_s3 = inlined_call_operand.vmem [shape: f32[1,32], index: 3, kind: input, shape index: {}]   ;;  %s1257_s4 = inlined_call_operand.hbm [shape: bf16[2,32,32], index: 4, kind: input, shape index: {}]   ;;  %s1258_s5 = inlined_call_operand.hbm [shape: bf16[2,32,32], index: 5, kind: input, shape index: {}]   ;;  %s1259_s6 = inlined_call_operand.vmem [shape: f32[2,32], index: 6, kind: input, shape index: {}]   ;;  %s1260_s7 = inlined_call_operand.vmem [shape: bf16[32,128], index: 7, kind: input, shape index: {}]   ;;  %s1261_s8 = inlined_call_operand.vmem [shape: f32[1,128], index: 8, kind: input, shape index: {}]   ;;  %s1262_s9 = inlined_call_operand.hbm [shape: f32[2,1,128], index: 9, kind: output, shape index: {}]  }
   0x1   :  { %15 = vsyncpa [#allocation6], 0 }
   0x2   :  { %16 = vsyncpa [#allocation4], 0 }
   0x3   :  { %18 = vsyncpa [#allocation4 + $0x1], 0  ;;  %s1098_s30 = smov 0   ;;  %s1100_s10 = smov 0  }
   0x4   :  { %s1102_s11 = smov 0   ;;  %s1104_s12 = smov 0  }
   0x5 LB: > { %s1119_s13 = sadd.s32 4294967295, %s1041_s12   ;;  %s768_s14 = sadd.s32 4294967294, %s1041_s12   ;;  %s1041_s12 = sphi %s1104_s12, %s1269_s12   ;;  %s1037_s11 = sphi %s1102_s11, %s1268_s11   ;;  %s1033_s10 = sphi %s1100_s10, %s1267_s10   ;;  %s1029_s30 = sphi %s1098_s30, %s1266_s30  }
   0x6   : > { %s1123_s15 = sadd.s32 1, %s1041_s12   ;;  %s225_s16 = sadd.s32 1, %s1037_s11 }
   0x7   : > { %s222_s17 = ssub.s32 %s1041_s12, %s1123_s15  ;;  %p235_p0 = scmp.ne.s32.totalorder %s1037_s11, %s1033_s10 }
   0x8   : > { %p223_p1 = scmp.eq.s32.totalorder %s222_s17, 0  ;;  %p236_p2 = scmp.eq.s32.totalorder %s1119_s13, 1 }
   0x9   : > { %p241_p3 = scmp.ne.s32.totalorder %s1033_s10, %s1029_s30  ;;  %p242_p4 = scmp.eq.s32.totalorder %s768_s14, 1 }
   0xa   : > { %s1134_s18 = scalar_select %p223_p1, %s1037_s11, %s225_s16  }
   0xb   : > { %p1136_p5 = por %p236_p2, %p235_p0  ;;  %p1140_p6 = por %p242_p4, %p241_p3 }
   0xc   : > { %p769_p7 = scmp.ge.s32.totalorder %s1041_s12, 1  ;;  %p249_p8 = scmp.lt.s32.totalorder %s1041_s12, 3 }
   0xd   : > { %p864_p9 = scmp.eq.s32.totalorder %s1119_s13, 0  ;;  %s269_s24 = sshll.u32 %s1257_s4, 4  ;;  %s270_s24 = int_to_ptr.hbm [resolvable:$true] %s269_s24 }
   0xe   : > { %p1147_p10 = pnand %p769_p7, %p249_p8  ;;  %s1043_s25 = smov [#allocation2]  }
   0xf   : > { %s271_s26 = sshll.u32 %s1043_s25, 4  ;;  %s283_s29 = sshll.u32 %s1258_s5, 4  ;;  %s272_s26 = int_to_ptr.vmem [resolvable:$true] %s271_s26  ;;  %s284_s29 = int_to_ptr.hbm [resolvable:$true] %s283_s29 }
  0x10   : > { %p853_p11 = pneg %p1147_p10  ;;  %s1044_s14 = smov 64  }
  0x11   : > { %s1045_s16 = smov 4   ;;  %s1046_s17 = smov [#allocation5]  }
  0x12   : > { %p854_p12 = pnand %p864_p9, %p853_p11  ;;  %s285_s22 = sshll.u32 %s1046_s17, 4  ;;  %s286_s22 = int_to_ptr.vmem [resolvable:$true] %s285_s22 }
  0x13   : > { %318 = sbr.rel (%p1147_p10) target bundleno = 660 (0x294), region = 56 }
  0x14   : > { %856 = dma.hbm_to_vmem [thread:$0]  (!%p854_p12), %s270_s24, 512, %s272_s26, [#allocation3], %s1044_s14, %s1044_s14, %s1045_s16  }
  0x15   : > { %859 = dma.hbm_to_vmem [thread:$0]  (!%p854_p12), %s284_s29, 512, %s286_s22, [#allocation6], %s1044_s14, %s1044_s14, %s1045_s16  }
  0x18   : > { %1016 = dma.done.wait (%p864_p9), [#allocation3], 512  }
  0x19   : > { %1018 = vsyncadd (%p864_p9), [#allocation3], 4294966784 }
  0x1a   : > { %1020 = dma.done.wait (%p864_p9), [#allocation6], 512  }
  0x1b   : > { %1022 = vsyncadd (%p864_p9), [#allocation6], 4294966784  ;;  %p359_p13 = scmp.lt.s32.totalorder %s1119_s13, 1  ;;  %v1047_v0 = vmov 16.0   ;;  %vm398_vm0 = vcmask 1043456   ;;  %vm372_vm1 = vcmask 64512   ;;  %s687_s17 = scalar_lea.hbm %s1262_s9, %s1119_s13 }
  0x1c   : > { %909 = vrcp.f32 %v1047_v0  ;;  %v367_v2 = vld [vmem:[%s1254_s1] sm:$0xf]  ;;  %v834_v26 = vld [vmem:[#allocation2 + $0x8] sm:$0xff]  ;;  %vm457_vm3 = vcmask 261120   ;;  %v838_v58 = vld [vmem:[#allocation2 + $0x18] sm:$0xff]  ;;  %s357_s29 = sand.u32 1, %s1033_s10  }
  0x1d   : > { %s360_s23 = scalar_select %p359_p13, %s1119_s13, 1  ;;  %v400_v5 = vsel %vm398_vm0, %v367_v2, 0  ;;  %v368_v8 = vld [vmem:[%s1255_s2] sm:$0xf]  ;;  %494 = vmatpush.bf16.msra.mxu2 %v834_v26  ;;  %v836_v28 = vld [vmem:[#allocation5 + $0x8] sm:$0xff]  ;;  %v837_v59 = vld [vmem:[#allocation2 + $0x10] sm:$0xff] }
  0x1e   : > { %409 = vmatpush.bf16.msra.mxu0 %v400_v5  ;;  %v421_v10 = vsel %vm398_vm0, %v368_v8, 0  ;;  %v833_v27 = vld [vmem:[#allocation2] sm:$0xff]  ;;  %524 = vmatpush.bf16.msra.mxu3 %v836_v28  ;;  %v840_v60 = vld [vmem:[#allocation5 + $0x18] sm:$0xff]  ;;  %v839_v61 = vld [vmem:[#allocation5 + $0x10] sm:$0xff]  ;;  %s691_s25 = sshll.u32 %s687_s17, 4  ;;  %s991_s16 = scalar_lea.hbm %s1262_s9, 2  ;;  %s692_s25 = int_to_ptr.hbm [resolvable:$true] %s691_s25 }
  0x1f   : > { %s831_s21 = sshll.u32 %s360_s23, 3  ;;  %430 = vmatpush.bf16.msra.mxu1 %v421_v10  ;;  %v835_v29 = vld [vmem:[#allocation5] sm:$0xff]  ;;  %s985_s27 = sshra.s32 %s692_s25, 4  ;;  %s986_s27 = int_to_ptr.hbm [resolvable:$true] %s985_s27 }
  0x20   : > { %s363_s26 = scalar_lea.vmem %s1253_s0, %s831_s21  ;;  %v906_v33 = vld [vmem:[%s1256_s3] ss:$0 sm:$0xff]  ;;  %s358_s21 = scalar_lea.vmem [#allocation7], %s357_s29 }
  0x21   : > { %v365_v3 = vld [vmem:[%s363_s26] sm:$0xff]   ;;  %495 = vmatpush.bf16.msra.mxu2 %v833_v27  ;;  %v842_v27 = vld [vmem:[%s1260_s7 + $0x8] sm:$0xff]  ;;  %s689_s24 = sshll.u32 %s358_s21, 4  ;;  %s987_s28 = scalar_lea.hbm %s986_s27, 1  ;;  %s690_s24 = int_to_ptr.vmem [resolvable:$true] %s689_s24 }
  0x22   : > { %v910_v1 = vpop.eup %909  ;;  %v832_v4 = vld [vmem:[%s363_s26] sm:$0xff]  ;;  %v370_v6 = vunpack.c.l.bf16 %v365_v3  ;;  %v371_v7 = vunpack.c.h.bf16 %v365_v3  ;;  %525 = vmatpush.bf16.msra.mxu3 %v835_v29  ;;  %588 = vmatpush.bf16.msrb.mxu0 %v838_v58  ;;  %s679_s26 = scalar_lea.sflag [#allocation4], %s357_s29  ;;  %p988_p0 = scmp.ne.s32.totalorder %s986_s27, %s987_s28 }
  0x23   : > { %v383_v9 = vmul.f32 16.0, %v910_v1  ;;  %782 = vmatmul.msk.bf16.vlgmr.msra.gmra.mxu0 %vm372_vm1, %v832_v4  ;;  %vm387_vm2 = vweird.f32 %v910_v1  ;;  %618 = vmatpush.bf16.msrb.mxu1 %v840_v60  ;;  %v841_v28 = vld [vmem:[%s1260_s7] sm:$0xff]  ;;  %p992_p3 = scmp.lt.s32.totalorder %s986_s27, %s1262_s9  ;;  %p993_p4 = scmp.lt.s32.totalorder %s991_s16, %s987_s28 }
  0x24   : > { %v373_v11 = vsel %vm372_vm1, %v370_v6, 0.0  ;;  %v374_v12 = vsel %vm372_vm1, %v371_v7, 0.0  ;;  %p989_p1 = pnand %p988_p0, %p1136_p5 }
  0x25   : > { %v384_v13 = vsub.f32 1.0, %v383_v9  ;;  %v375_v14 = vadd.f32 %v374_v12, %v373_v11  ;;  %670 = vmatpush.bf16.msrb.mxu2 %v842_v27  ;;  %p994_p7 = por %p993_p4, %p992_p3 }
  0x26   : > { %589 = vmatpush.bf16.msrb.mxu0 %v837_v59  ;;  %p990_p2 = pneg %p989_p1 }
  0x27   : > { %v376_v15 = vrot.slane %v375_v14, 4  ;;  %v385_v16 = vmul.f32 %v910_v1, %v384_v13  ;;  %619 = vmatpush.bf16.msrb.mxu1 %v839_v61 }
  0x28   : > { %p995_p8 = pnand %p994_p7, %p990_p2 }
  0x29   : > { %v377_v17 = vadd.f32 %v376_v15, %v375_v14  ;;  %v386_v19 = vadd.f32 %v910_v1, %v385_v16  ;;  %671 = vmatpush.bf16.msrb.mxu2 %v841_v28 }
  0x2b   : > { %v378_v18 = vrot.slane %v377_v17, 2  ;;  %v1185_v22 = vsel %vm387_vm2, %v910_v1, %v386_v19  ;;  %v907_v1 = vld [vmem:[%s1259_s6] ss:$0 sm:$0xff] }
  0x2d   : > { %v379_v20 = vadd.f32 %v378_v18, %v377_v17 }
  0x2f   : > { %v380_v21 = vrot.slane %v379_v20, 1 }
  0x31   : > { %v381_v23 = vadd.f32 %v380_v21, %v379_v20 }
  0x33   : > { %v389_v24 = vmul.f32 %v1185_v22, %v381_v23 }
  0x35   : > { %v416_v25 = vpack.c.bf16 %v389_v24, %v389_v24 }
  0x37   : > { %783 = vmatmul.msk.bf16.vlgmr.msra.gmra.mxu1 %vm372_vm1, %v416_v25 }
  0xa0   : > { %v411_v30 = vpop.f32.mrf.mxu0 }
  0xa8   : > { %v413_v34 = vpop.f32.mrf.mxu0 }
  0xb4   : > { %v432_v31 = vpop.f32.mrf.mxu1 }
  0xb5   : > { %v436_v32 = vperm.slane %v432_v31, 0 }
  0xb7   : > { %v437_v35 = vadd.f32 %v436_v32, %v411_v30  ;;  %v438_v36 = vadd.f32 %v436_v32, %v413_v34  ;;  %v908_v32 = vld [vmem:[%s1259_s6 + $0x1] ss:$0 sm:$0xff] }
  0xb9   : > { %v442_v37 = vadd.f32 %v906_v33, %v437_v35  ;;  %v443_v38 = vadd.f32 %v906_v33, %v438_v36 }
  0xbb   : > { %v444_v39 = vmax.f32 %v442_v37, 0.0  ;;  %v445_v40 = vmax.f32 %v443_v38, 0.0 }
  0xbc   : > { %v434_v41 = vpop.f32.mrf.mxu1 }
  0xbd   : > { %v458_v42 = vsel %vm457_vm3, %v444_v39, 0.0  ;;  %v459_v43 = vsel %vm457_vm3, %v445_v40, 0.0  ;;  %v455_v44 = vpack.c.bf16 %v444_v39, %v444_v39  ;;  %v456_v45 = vpack.c.bf16 %v445_v40, %v445_v40 }
  0xbe   : > { %v460_v46 = vadd.f32 %v459_v43, %v458_v42 }
  0xbf   : > { %v470_v47 = vunpack.c.l.b16 %v455_v44  ;;  %v471_v48 = vunpack.c.l.b16 %v456_v45 }
  0xc0   : > { %v461_v49 = vrot.slane %v460_v46, 4 }
  0xc1   : > { %v472_v50 = vpack.c.b16 %v471_v48, %v470_v47 }
  0xc2   : > { %v462_v51 = vadd.f32 %v461_v49, %v460_v46 }
  0xc3   : > { %792 = vmatmul.msk.bf16.vlgmr.msra.gmra.mxu2 %vm457_vm3, %v472_v50 }
  0xc4   : > { %v463_v52 = vrot.slane %v462_v51, 2 }
  0xc6   : > { %v464_v53 = vadd.f32 %v463_v52, %v462_v51  ;;  %v648_v52 = vld [vmem:[%s1261_s8] sm:$0x1] }
  0xc8   : > { %v465_v54 = vrot.slane %v464_v53, 1 }
  0xca   : > { %v466_v55 = vadd.f32 %v465_v54, %v464_v53 }
  0xcc   : > { %v467_v56 = vmul.f32 %v466_v55, %v1185_v22 }
  0xce   : > { %v502_v57 = vpack.c.bf16 %v467_v56, %v467_v56 }
  0xd0   : > { %801 = vmatmul.msk.bf16.vlgmr.msra.gmra.mxu3 %vm457_vm3, %v502_v57 }
 0x146   : > { %v497_v62 = vpop.f32.mrf.mxu2 }
 0x14e   : > { %v499_v2 = vpop.f32.mrf.mxu2 }
 0x153   : > { %v527_v63 = vpop.f32.mrf.mxu3 }
 0x154   : > { %v531_v0 = vperm.slane %v527_v63, 0 }
 0x156   : > { %v532_v3 = vadd.f32 %v531_v0, %v497_v62  ;;  %v533_v4 = vadd.f32 %v531_v0, %v499_v2 }
 0x158   : > { %v535_v5 = vadd.f32 %v907_v1, %v532_v3  ;;  %v536_v6 = vadd.f32 %v907_v1, %v533_v4 }
 0x15a   : > { %v537_v7 = vmax.f32 %v535_v5, 0.0  ;;  %v538_v8 = vmax.f32 %v536_v6, 0.0 }
 0x15b   : > { %v529_v9 = vpop.f32.mrf.mxu3 }
 0x15c   : > { %v550_v10 = vpack.c.bf16 %v537_v7, %v537_v7  ;;  %v551_v11 = vpack.c.bf16 %v538_v8, %v538_v8  ;;  %v552_v12 = vsel %vm457_vm3, %v537_v7, 0.0  ;;  %v553_v13 = vsel %vm457_vm3, %v538_v8, 0.0 }
 0x15d   : > { %v554_v14 = vadd.f32 %v553_v13, %v552_v12 }
 0x15e   : > { %v564_v15 = vunpack.c.l.b16 %v550_v10  ;;  %v565_v16 = vunpack.c.l.b16 %v551_v11 }
 0x15f   : > { %v555_v17 = vrot.slane %v554_v14, 4 }
 0x160   : > { %v566_v18 = vpack.c.b16 %v565_v16, %v564_v15 }
 0x161   : > { %v556_v19 = vadd.f32 %v555_v17, %v554_v14 }
 0x162   : > { %810 = vmatmul.msk.bf16.vlgmr.msrb.gmra.mxu0 %vm457_vm3, %v566_v18 }
 0x163   : > { %v557_v20 = vrot.slane %v556_v19, 2 }
 0x165   : > { %v558_v21 = vadd.f32 %v557_v20, %v556_v19 }
 0x167   : > { %v559_v23 = vrot.slane %v558_v21, 1 }
 0x169   : > { %v560_v24 = vadd.f32 %v559_v23, %v558_v21 }
 0x16b   : > { %v561_v25 = vmul.f32 %v560_v24, %v1185_v22 }
 0x16d   : > { %v596_v26 = vpack.c.bf16 %v561_v25, %v561_v25 }
 0x16f   : > { %819 = vmatmul.msk.bf16.vlgmr.msrb.gmra.mxu1 %vm457_vm3, %v596_v26 }
 0x1df   : > { %v591_v29 = vpop.f32.mrf.mxu0 }
 0x1e7   : > { %v593_v33 = vpop.f32.mrf.mxu0 }
 0x1ec   : > { %v621_v30 = vpop.f32.mrf.mxu1 }
 0x1ed   : > { %v625_v31 = vperm.slane %v621_v30, 0 }
 0x1ef   : > { %v626_v34 = vadd.f32 %v625_v31, %v591_v29  ;;  %v627_v35 = vadd.f32 %v625_v31, %v593_v33 }
 0x1f1   : > { %v629_v36 = vadd.f32 %v908_v32, %v626_v34  ;;  %v630_v37 = vadd.f32 %v908_v32, %v627_v35 }
 0x1f3   : > { %v631_v38 = vmax.f32 %v629_v36, 0.0  ;;  %v632_v39 = vmax.f32 %v630_v37, 0.0 }
 0x1f4   : > { %v623_v40 = vpop.f32.mrf.mxu1 }
 0x1f5   : > { %v633_v41 = vsel %vm457_vm3, %v631_v38, 0.0  ;;  %v634_v42 = vsel %vm457_vm3, %v632_v39, 0.0 }
 0x1f6   : > { %v635_v43 = vadd.f32 %v634_v42, %v633_v41 }
 0x1f8   : > { %v636_v44 = vrot.slane %v635_v43, 4 }
 0x1fa   : > { %v637_v45 = vadd.f32 %v636_v44, %v635_v43 }
 0x1fc   : > { %v638_v46 = vrot.slane %v637_v45, 2 }
 0x1fe   : > { %v639_v47 = vadd.f32 %v638_v46, %v637_v45 }
 0x200   : > { %v640_v48 = vrot.slane %v639_v47, 1 }
 0x202   : > { %v641_v49 = vadd.f32 %v640_v48, %v639_v47 }
 0x204   : > { %v642_v50 = vmul.f32 %v641_v49, %v1185_v22 }
 0x206   : > { %v643_v51 = vpack.c.bf16 %v642_v50, %v642_v50 }
 0x208   : > { %828 = vmatmul.msk.bf16.vlgmr.msrb.gmra.mxu2 %vm457_vm3, %v643_v51 }
 0x28b   : > { %v673_v53 = vpop.f32.mrf.mxu2 }
 0x28c   : > { %v674_v54 = vadd.f32 %v673_v53, %v648_v52 }
 0x28e   : > { %677 = vst [vmem:[%s358_s21] sm:$0x1] %v674_v54 }
 0x28f   : > { %998 = shalt.err (!%p995_p8)
}
 0x290   : > { %851 = dma.vmem_to_hbm [thread:$0]  (%p1136_p5), %s690_s24, 16, %s692_s25, %s679_s26  }
 0x293   : > { %v675_v22 = vpop.f32.mrf.mxu2 }
 0x294 PF: > { %p868_p9 = scmp.ge.s32.totalorder %s1041_s12, 2  ;;  %s703_s29 = sand.u32 1, %s1029_s30  }
 0x295   : > { %s704_s17 = scalar_lea.sflag [#allocation4], %s703_s29 }
 0x296   : > { %p861_p10 = pnand %p868_p9, %p1140_p6 }
 0x298   : > { %p862_p11 = pneg %p861_p10 }
 0x29a   : > { %1024 = dma.done.wait (%p862_p11), %s704_s17, 16  }
 0x29b   : > { %1026 = vsyncadd (%p862_p11), %s704_s17, 4294967280  ;;  %p21_p12 = scmp.ge.s32.totalorder %s1123_s15, 4   ;;  %s1266_s30 = smov %s1033_s10 }
 0x29c   : > { %s1267_s10 = smov %s1037_s11  ;;  %s1268_s11 = smov %s1134_s18 }
 0x29d   : > { %s1269_s12 = smov %s1123_s15  ;;  %23 = sbr.rel (!%p21_p12) target bundleno = 5 (0x5), region = 102 }
 0x2a2   :  { %709 = vsyncpa [#allocation3], 1 }
 0x2a3   :  { %711 = vsyncpa [#allocation3 + $0x1], 1 }
 0x2a4   :  { %712 = vsyncpa [#allocation6], 1 }
 0x2a5   :  { %713 = vsyncpa [#allocation4], 1 }
 0x2a6   :  { %715 = vsyncpa [#allocation4 + $0x1], 1 }

// kernel: tpu_custom_call.1
= control target key start
LH: loop header
LB: loop body
LE: loop exit
PB: predicated region body
PF: predicated region fallthrough
CT: control target
= control target key end

     0   :  { %14 = vsyncpa [#allocation3], 0  ;;  %s1253_s0 = inlined_call_operand.vmem [shape: bf16[2,16,8], index: 0, kind: input, shape index: {}]   ;;  %s1254_s1 = inlined_call_operand.vmem [shape: bf16[8,32], index: 1, kind: input, shape index: {}]   ;;  %s1255_s2 = inlined_call_operand.vmem [shape: bf16[8,32], index: 2, kind: input, shape index: {}]   ;;  %s1256_s3 = inlined_call_operand.vmem [shape: f32[1,32], index: 3, kind: input, shape index: {}]   ;;  %s1257_s4 = inlined_call_operand.hbm [shape: bf16[2,32,32], index: 4, kind: input, shape index: {}]   ;;  %s1258_s5 = inlined_call_operand.hbm [shape: bf16[2,32,32], index: 5, kind: input, shape index: {}]   ;;  %s1259_s6 = inlined_call_operand.vmem [shape: f32[2,32], index: 6, kind: input, shape index: {}]   ;;  %s1260_s7 = inlined_call_operand.vmem [shape: bf16[32,128], index: 7, kind: input, shape index: {}]   ;;  %s1261_s8 = inlined_call_operand.vmem [shape: f32[1,128], index: 8, kind: input, shape index: {}]   ;;  %s1262_s9 = inlined_call_operand.hbm [shape: f32[2,1,128], index: 9, kind: output, shape index: {}]  }
   0x1   :  { %15 = vsyncpa [#allocation6], 0 }
   0x2   :  { %16 = vsyncpa [#allocation4], 0 }
   0x3   :  { %18 = vsyncpa [#allocation4 + $0x1], 0  ;;  %s1098_s30 = smov 0   ;;  %s1100_s10 = smov 0  }
   0x4   :  { %s1102_s11 = smov 0   ;;  %s1104_s12 = smov 0  }
   0x5 LB: > { %s1119_s13 = sadd.s32 4294967295, %s1041_s12   ;;  %s768_s14 = sadd.s32 4294967294, %s1041_s12   ;;  %s1041_s12 = sphi %s1104_s12, %s1269_s12   ;;  %s1037_s11 = sphi %s1102_s11, %s1268_s11   ;;  %s1033_s10 = sphi %s1100_s10, %s1267_s10   ;;  %s1029_s30 = sphi %s1098_s30, %s1266_s30  }
   0x6   : > { %s1123_s15 = sadd.s32 1, %s1041_s12   ;;  %s225_s16 = sadd.s32 1, %s1037_s11 }
   0x7   : > { %s222_s17 = ssub.s32 %s1041_s12, %s1123_s15  ;;  %p235_p0 = scmp.ne.s32.totalorder %s1037_s11, %s1033_s10 }
   0x8   : > { %p223_p1 = scmp.eq.s32.totalorder %s222_s17, 0  ;;  %p236_p2 = scmp.eq.s32.totalorder %s1119_s13, 1 }
   0x9   : > { %p241_p3 = scmp.ne.s32.totalorder %s1033_s10, %s1029_s30  ;;  %p242_p4 = scmp.eq.s32.totalorder %s768_s14, 1 }
   0xa   : > { %s1134_s18 = scalar_select %p223_p1, %s1037_s11, %s225_s16  }
   0xb   : > { %p1136_p5 = por %p236_p2, %p235_p0  ;;  %p1140_p6 = por %p242_p4, %p241_p3 }
   0xc   : > { %p769_p7 = scmp.ge.s32.totalorder %s1041_s12, 1  ;;  %p249_p8 = scmp.lt.s32.totalorder %s1041_s12, 3 }
   0xd   : > { %p864_p9 = scmp.eq.s32.totalorder %s1119_s13, 0  ;;  %s269_s24 = sshll.u32 %s1257_s4, 4  ;;  %s270_s24 = int_to_ptr.hbm [resolvable:$true] %s269_s24 }
   0xe   : > { %p1147_p10 = pnand %p769_p7, %p249_p8  ;;  %s1043_s25 = smov [#allocation2]  }
   0xf   : > { %s271_s26 = sshll.u32 %s1043_s25, 4  ;;  %s283_s29 = sshll.u32 %s1258_s5, 4  ;;  %s272_s26 = int_to_ptr.vmem [resolvable:$true] %s271_s26  ;;  %s284_s29 = int_to_ptr.hbm [resolvable:$true] %s283_s29 }
  0x10   : > { %p853_p11 = pneg %p1147_p10  ;;  %s1044_s14 = smov 64  }
  0x11   : > { %s1045_s16 = smov 4   ;;  %s1046_s17 = smov [#allocation5]  }
  0x12   : > { %p854_p12 = pnand %p864_p9, %p853_p11  ;;  %s285_s22 = sshll.u32 %s1046_s17, 4  ;;  %s286_s22 = int_to_ptr.vmem [resolvable:$true] %s285_s22 }
  0x13   : > { %318 = sbr.rel (%p1147_p10) target bundleno = 660 (0x294), region = 56 }
  0x14   : > { %856 = dma.hbm_to_vmem [thread:$0]  (!%p854_p12), %s270_s24, 512, %s272_s26, [#allocation3], %s1044_s14, %s1044_s14, %s1045_s16  }
  0x15   : > { %859 = dma.hbm_to_vmem [thread:$0]  (!%p854_p12), %s284_s29, 512, %s286_s22, [#allocation6], %s1044_s14, %s1044_s14, %s1045_s16  }
  0x18   : > { %1016 = dma.done.wait (%p864_p9), [#allocation3], 512  }
  0x19   : > { %1018 = vsyncadd (%p864_p9), [#allocation3], 4294966784 }
  0x1a   : > { %1020 = dma.done.wait (%p864_p9), [#allocation6], 512  }
  0x1b   : > { %1022 = vsyncadd (%p864_p9), [#allocation6], 4294966784  ;;  %p359_p13 = scmp.lt.s32.totalorder %s1119_s13, 1  ;;  %v1047_v0 = vmov 16.0   ;;  %vm398_vm0 = vcmask 1043456   ;;  %vm372_vm1 = vcmask 64512   ;;  %s687_s17 = scalar_lea.hbm %s1262_s9, %s1119_s13 }
  0x1c   : > { %909 = vrcp.f32 %v1047_v0  ;;  %v367_v2 = vld [vmem:[%s1254_s1] sm:$0xf]  ;;  %v834_v26 = vld [vmem:[#allocation2 + $0x8] sm:$0xff]  ;;  %vm457_vm3 = vcmask 261120   ;;  %v838_v58 = vld [vmem:[#allocation2 + $0x18] sm:$0xff]  ;;  %s357_s29 = sand.u32 1, %s1033_s10  }
  0x1d   : > { %s360_s23 = scalar_select %p359_p13, %s1119_s13, 1  ;;  %v400_v5 = vsel %vm398_vm0, %v367_v2, 0  ;;  %v368_v8 = vld [vmem:[%s1255_s2] sm:$0xf]  ;;  %494 = vmatpush.bf16.msra.mxu2 %v834_v26  ;;  %v836_v28 = vld [vmem:[#allocation5 + $0x8] sm:$0xff]  ;;  %v837_v59 = vld [vmem:[#allocation2 + $0x10] sm:$0xff] }
  0x1e   : > { %409 = vmatpush.bf16.msra.mxu0 %v400_v5  ;;  %v421_v10 = vsel %vm398_vm0, %v368_v8, 0  ;;  %v833_v27 = vld [vmem:[#allocation2] sm:$0xff]  ;;  %524 = vmatpush.bf16.msra.mxu3 %v836_v28  ;;  %v840_v60 = vld [vmem:[#allocation5 + $0x18] sm:$0xff]  ;;  %v839_v61 = vld [vmem:[#allocation5 + $0x10] sm:$0xff]  ;;  %s691_s25 = sshll.u32 %s687_s17, 4  ;;  %s991_s16 = scalar_lea.hbm %s1262_s9, 2  ;;  %s692_s25 = int_to_ptr.hbm [resolvable:$true] %s691_s25 }
  0x1f   : > { %s831_s21 = sshll.u32 %s360_s23, 3  ;;  %430 = vmatpush.bf16.msra.mxu1 %v421_v10  ;;  %v835_v29 = vld [vmem:[#allocation5] sm:$0xff]  ;;  %s985_s27 = sshra.s32 %s692_s25, 4  ;;  %s986_s27 = int_to_ptr.hbm [resolvable:$true] %s985_s27 }
  0x20   : > { %s363_s26 = scalar_lea.vmem %s1253_s0, %s831_s21  ;;  %v906_v33 = vld [vmem:[%s1256_s3] ss:$0 sm:$0xff]  ;;  %s358_s21 = scalar_lea.vmem [#allocation7], %s357_s29 }
  0x21   : > { %v365_v3 = vld [vmem:[%s363_s26] sm:$0xff]   ;;  %495 = vmatpush.bf16.msra.mxu2 %v833_v27  ;;  %v842_v27 = vld [vmem:[%s1260_s7 + $0x8] sm:$0xff]  ;;  %s689_s24 = sshll.u32 %s358_s21, 4  ;;  %s987_s28 = scalar_lea.hbm %s986_s27, 1  ;;  %s690_s24 = int_to_ptr.vmem [resolvable:$true] %s689_s24 }
  0x22   : > { %v910_v1 = vpop.eup %909  ;;  %v832_v4 = vld [vmem:[%s363_s26] sm:$0xff]  ;;  %v370_v6 = vunpack.c.l.bf16 %v365_v3  ;;  %v371_v7 = vunpack.c.h.bf16 %v365_v3  ;;  %525 = vmatpush.bf16.msra.mxu3 %v835_v29  ;;  %588 = vmatpush.bf16.msrb.mxu0 %v838_v58  ;;  %s679_s26 = scalar_lea.sflag [#allocation4], %s357_s29  ;;  %p988_p0 = scmp.ne.s32.totalorder %s986_s27, %s987_s28 }
  0x23   : > { %v383_v9 = vmul.f32 16.0, %v910_v1  ;;  %782 = vmatmul.msk.bf16.vlgmr.msra.gmra.mxu0 %vm372_vm1, %v832_v4  ;;  %vm387_vm2 = vweird.f32 %v910_v1  ;;  %618 = vmatpush.bf16.msrb.mxu1 %v840_v60  ;;  %v841_v28 = vld [vmem:[%s1260_s7] sm:$0xff]  ;;  %p992_p3 = scmp.lt.s32.totalorder %s986_s27, %s1262_s9  ;;  %p993_p4 = scmp.lt.s32.totalorder %s991_s16, %s987_s28 }
  0x24   : > { %v373_v11 = vsel %vm372_vm1, %v370_v6, 0.0  ;;  %v374_v12 = vsel %vm372_vm1, %v371_v7, 0.0  ;;  %p989_p1 = pnand %p988_p0, %p1136_p5 }
  0x25   : > { %v384_v13 = vsub.f32 1.0, %v383_v9  ;;  %v375_v14 = vadd.f32 %v374_v12, %v373_v11  ;;  %670 = vmatpush.bf16.msrb.mxu2 %v842_v27  ;;  %p994_p7 = por %p993_p4, %p992_p3 }
  0x26   : > { %589 = vmatpush.bf16.msrb.mxu0 %v837_v59  ;;  %p990_p2 = pneg %p989_p1 }
  0x27   : > { %v376_v15 = vrot.slane %v375_v14, 4  ;;  %v385_v16 = vmul.f32 %v910_v1, %v384_v13  ;;  %619 = vmatpush.bf16.msrb.mxu1 %v839_v61 }
  0x28   : > { %p995_p8 = pnand %p994_p7, %p990_p2 }
  0x29   : > { %v377_v17 = vadd.f32 %v376_v15, %v375_v14  ;;  %v386_v19 = vadd.f32 %v910_v1, %v385_v16  ;;  %671 = vmatpush.bf16.msrb.mxu2 %v841_v28 }
  0x2b   : > { %v378_v18 = vrot.slane %v377_v17, 2  ;;  %v1185_v22 = vsel %vm387_vm2, %v910_v1, %v386_v19  ;;  %v907_v1 = vld [vmem:[%s1259_s6] ss:$0 sm:$0xff] }
  0x2d   : > { %v379_v20 = vadd.f32 %v378_v18, %v377_v17 }
  0x2f   : > { %v380_v21 = vrot.slane %v379_v20, 1 }
  0x31   : > { %v381_v23 = vadd.f32 %v380_v21, %v379_v20 }
  0x33   : > { %v389_v24 = vmul.f32 %v1185_v22, %v381_v23 }
  0x35   : > { %v416_v25 = vpack.c.bf16 %v389_v24, %v389_v24 }
  0x37   : > { %783 = vmatmul.msk.bf16.vlgmr.msra.gmra.mxu1 %vm372_vm1, %v416_v25 }
  0xa0   : > { %v411_v30 = vpop.f32.mrf.mxu0 }
  0xa8   : > { %v413_v34 = vpop.f32.mrf.mxu0 }
  0xb4   : > { %v432_v31 = vpop.f32.mrf.mxu1 }
  0xb5   : > { %v436_v32 = vperm.slane %v432_v31, 0 }
  0xb7   : > { %v437_v35 = vadd.f32 %v436_v32, %v411_v30  ;;  %v438_v36 = vadd.f32 %v436_v32, %v413_v34  ;;  %v908_v32 = vld [vmem:[%s1259_s6 + $0x1] ss:$0 sm:$0xff] }
  0xb9   : > { %v442_v37 = vadd.f32 %v906_v33, %v437_v35  ;;  %v443_v38 = vadd.f32 %v906_v33, %v438_v36 }
  0xbb   : > { %v444_v39 = vmax.f32 %v442_v37, 0.0  ;;  %v445_v40 = vmax.f32 %v443_v38, 0.0 }
  0xbc   : > { %v434_v41 = vpop.f32.mrf.mxu1 }
  0xbd   : > { %v458_v42 = vsel %vm457_vm3, %v444_v39, 0.0  ;;  %v459_v43 = vsel %vm457_vm3, %v445_v40, 0.0  ;;  %v455_v44 = vpack.c.bf16 %v444_v39, %v444_v39  ;;  %v456_v45 = vpack.c.bf16 %v445_v40, %v445_v40 }
  0xbe   : > { %v460_v46 = vadd.f32 %v459_v43, %v458_v42 }
  0xbf   : > { %v470_v47 = vunpack.c.l.b16 %v455_v44  ;;  %v471_v48 = vunpack.c.l.b16 %v456_v45 }
  0xc0   : > { %v461_v49 = vrot.slane %v460_v46, 4 }
  0xc1   : > { %v472_v50 = vpack.c.b16 %v471_v48, %v470_v47 }
  0xc2   : > { %v462_v51 = vadd.f32 %v461_v49, %v460_v46 }
  0xc3   : > { %792 = vmatmul.msk.bf16.vlgmr.msra.gmra.mxu2 %vm457_vm3, %v472_v50 }
  0xc4   : > { %v463_v52 = vrot.slane %v462_v51, 2 }
  0xc6   : > { %v464_v53 = vadd.f32 %v463_v52, %v462_v51  ;;  %v648_v52 = vld [vmem:[%s1261_s8] sm:$0x1] }
  0xc8   : > { %v465_v54 = vrot.slane %v464_v53, 1 }
  0xca   : > { %v466_v55 = vadd.f32 %v465_v54, %v464_v53 }
  0xcc   : > { %v467_v56 = vmul.f32 %v466_v55, %v1185_v22 }
  0xce   : > { %v502_v57 = vpack.c.bf16 %v467_v56, %v467_v56 }
  0xd0   : > { %801 = vmatmul.msk.bf16.vlgmr.msra.gmra.mxu3 %vm457_vm3, %v502_v57 }
 0x146   : > { %v497_v62 = vpop.f32.mrf.mxu2 }
 0x14e   : > { %v499_v2 = vpop.f32.mrf.mxu2 }
 0x153   : > { %v527_v63 = vpop.f32.mrf.mxu3 }
 0x154   : > { %v531_v0 = vperm.slane %v527_v63, 0 }
 0x156   : > { %v532_v3 = vadd.f32 %v531_v0, %v497_v62  ;;  %v533_v4 = vadd.f32 %v531_v0, %v499_v2 }
 0x158   : > { %v535_v5 = vadd.f32 %v907_v1, %v532_v3  ;;  %v536_v6 = vadd.f32 %v907_v1, %v533_v4 }
 0x15a   : > { %v537_v7 = vmax.f32 %v535_v5, 0.0  ;;  %v538_v8 = vmax.f32 %v536_v6, 0.0 }
 0x15b   : > { %v529_v9 = vpop.f32.mrf.mxu3 }
 0x15c   : > { %v550_v10 = vpack.c.bf16 %v537_v7, %v537_v7  ;;  %v551_v11 = vpack.c.bf16 %v538_v8, %v538_v8  ;;  %v552_v12 = vsel %vm457_vm3, %v537_v7, 0.0  ;;  %v553_v13 = vsel %vm457_vm3, %v538_v8, 0.0 }
 0x15d   : > { %v554_v14 = vadd.f32 %v553_v13, %v552_v12 }
 0x15e   : > { %v564_v15 = vunpack.c.l.b16 %v550_v10  ;;  %v565_v16 = vunpack.c.l.b16 %v551_v11 }
 0x15f   : > { %v555_v17 = vrot.slane %v554_v14, 4 }
 0x160   : > { %v566_v18 = vpack.c.b16 %v565_v16, %v564_v15 }
 0x161   : > { %v556_v19 = vadd.f32 %v555_v17, %v554_v14 }
 0x162   : > { %810 = vmatmul.msk.bf16.vlgmr.msrb.gmra.mxu0 %vm457_vm3, %v566_v18 }
 0x163   : > { %v557_v20 = vrot.slane %v556_v19, 2 }
 0x165   : > { %v558_v21 = vadd.f32 %v557_v20, %v556_v19 }
 0x167   : > { %v559_v23 = vrot.slane %v558_v21, 1 }
 0x169   : > { %v560_v24 = vadd.f32 %v559_v23, %v558_v21 }
 0x16b   : > { %v561_v25 = vmul.f32 %v560_v24, %v1185_v22 }
 0x16d   : > { %v596_v26 = vpack.c.bf16 %v561_v25, %v561_v25 }
 0x16f   : > { %819 = vmatmul.msk.bf16.vlgmr.msrb.gmra.mxu1 %vm457_vm3, %v596_v26 }
 0x1df   : > { %v591_v29 = vpop.f32.mrf.mxu0 }
 0x1e7   : > { %v593_v33 = vpop.f32.mrf.mxu0 }
 0x1ec   : > { %v621_v30 = vpop.f32.mrf.mxu1 }
 0x1ed   : > { %v625_v31 = vperm.slane %v621_v30, 0 }
 0x1ef   : > { %v626_v34 = vadd.f32 %v625_v31, %v591_v29  ;;  %v627_v35 = vadd.f32 %v625_v31, %v593_v33 }
 0x1f1   : > { %v629_v36 = vadd.f32 %v908_v32, %v626_v34  ;;  %v630_v37 = vadd.f32 %v908_v32, %v627_v35 }
 0x1f3   : > { %v631_v38 = vmax.f32 %v629_v36, 0.0  ;;  %v632_v39 = vmax.f32 %v630_v37, 0.0 }
 0x1f4   : > { %v623_v40 = vpop.f32.mrf.mxu1 }
 0x1f5   : > { %v633_v41 = vsel %vm457_vm3, %v631_v38, 0.0  ;;  %v634_v42 = vsel %vm457_vm3, %v632_v39, 0.0 }
 0x1f6   : > { %v635_v43 = vadd.f32 %v634_v42, %v633_v41 }
 0x1f8   : > { %v636_v44 = vrot.slane %v635_v43, 4 }
 0x1fa   : > { %v637_v45 = vadd.f32 %v636_v44, %v635_v43 }
 0x1fc   : > { %v638_v46 = vrot.slane %v637_v45, 2 }
 0x1fe   : > { %v639_v47 = vadd.f32 %v638_v46, %v637_v45 }
 0x200   : > { %v640_v48 = vrot.slane %v639_v47, 1 }
 0x202   : > { %v641_v49 = vadd.f32 %v640_v48, %v639_v47 }
 0x204   : > { %v642_v50 = vmul.f32 %v641_v49, %v1185_v22 }
 0x206   : > { %v643_v51 = vpack.c.bf16 %v642_v50, %v642_v50 }
 0x208   : > { %828 = vmatmul.msk.bf16.vlgmr.msrb.gmra.mxu2 %vm457_vm3, %v643_v51 }
 0x28b   : > { %v673_v53 = vpop.f32.mrf.mxu2 }
 0x28c   : > { %v674_v54 = vadd.f32 %v673_v53, %v648_v52 }
 0x28e   : > { %677 = vst [vmem:[%s358_s21] sm:$0x1] %v674_v54 }
 0x28f   : > { %998 = shalt.err (!%p995_p8)
}
 0x290   : > { %851 = dma.vmem_to_hbm [thread:$0]  (%p1136_p5), %s690_s24, 16, %s692_s25, %s679_s26  }
 0x293   : > { %v675_v22 = vpop.f32.mrf.mxu2 }
 0x294 PF: > { %p868_p9 = scmp.ge.s32.totalorder %s1041_s12, 2  ;;  %s703_s29 = sand.u32 1, %s1029_s30  }
 0x295   : > { %s704_s17 = scalar_lea.sflag [#allocation4], %s703_s29 }
 0x296   : > { %p861_p10 = pnand %p868_p9, %p1140_p6 }
 0x298   : > { %p862_p11 = pneg %p861_p10 }
 0x29a   : > { %1024 = dma.done.wait (%p862_p11), %s704_s17, 16  }
 0x29b   : > { %1026 = vsyncadd (%p862_p11), %s704_s17, 4294967280  ;;  %p21_p12 = scmp.ge.s32.totalorder %s1123_s15, 4   ;;  %s1266_s30 = smov %s1033_s10 }
 0x29c   : > { %s1267_s10 = smov %s1037_s11  ;;  %s1268_s11 = smov %s1134_s18 }
 0x29d   : > { %s1269_s12 = smov %s1123_s15  ;;  %23 = sbr.rel (!%p21_p12) target bundleno = 5 (0x5), region = 102 }
 0x2a2   :  { %709 = vsyncpa [#allocation3], 1 }
 0x2a3   :  { %711 = vsyncpa [#allocation3 + $0x1], 1 }
 0x2a4   :  { %712 = vsyncpa [#allocation6], 1 }
 0x2a5   :  { %713 = vsyncpa [#allocation4], 1 }
 0x2a6   :  { %715 = vsyncpa [#allocation4 + $0x1], 1 }

</bundles_post_ra>
